<compile_context>
chip_gen: v6e
topology: v6e:2x2x1
jax: 0.10.0
libtpu: 0.0.40
codegen_flags: <defaults>
</compile_context>

<pallas_src>
import jax
import jax.numpy as jnp
from jax.experimental import pallas as pl
from jax.experimental.pallas import tpu as pltpu


def _lstm_cell_kernel(x_ref, h_ref, c_ref, wx_ref, wh_ref, b_ref,
                      h_out_ref, c_out_ref):
    H = h_ref.shape[1]

    # Two MXU dots feeding one f32 accumulator (replaces concat + single dot).
    gates = jnp.dot(x_ref[...], wx_ref[...], preferred_element_type=jnp.float32)
    gates = gates + jnp.dot(h_ref[...], wh_ref[...],
                            preferred_element_type=jnp.float32)
    gates = gates + b_ref[...].astype(jnp.float32)

    forget_part = gates[:, 0 * H:1 * H]
    input_part = gates[:, 1 * H:2 * H]
    cell_part = gates[:, 2 * H:3 * H]
    output_part = gates[:, 3 * H:4 * H]

    def sigmoid(v):
        # == 1 / (1 + exp(-v)) (the module's Sigmoid.forward), one EUP op.
        return 0.5 * (jnp.tanh(0.5 * v) + 1.0)

    # jnp.tanh == (exp(v)-exp(-v))/(exp(v)+exp(-v)) (the module's Tanh.forward),
    # but overflow-free and a single EUP op.
    c_prev = c_ref[...].astype(jnp.float32)
    new_c = sigmoid(forget_part) * c_prev + sigmoid(input_part) * jnp.tanh(cell_part)
    new_h = sigmoid(output_part) * jnp.tanh(new_c)

    c_out_ref[...] = new_c.astype(c_out_ref.dtype)
    h_out_ref[...] = new_h.astype(h_out_ref.dtype)


def prepare_lstm_params(weight, bias):
    """One-time param prep (hoisted out of the per-step hot path).

    weight: (4H, inSize + H) with nn.Linear layout; bias: (4H,).
    Returns (wxT, whT, b2): transposed x-half, transposed h-half, and a
    broadcastable bias, reusable across every timestep/call.
    """
    four_h, k = weight.shape
    H = four_h // 4
    in_size = k - H
    wT = weight.T                    # (inSize + H, 4H)
    wxT = jnp.asarray(wT[:in_size])  # (inSize, 4H)
    whT = jnp.asarray(wT[in_size:])  # (H, 4H)
    b2 = bias.reshape(1, four_h)     # (1, 4H)
    return wxT, whT, b2


def lstm_cell(x, h, c, wxT, whT, b2):
    """Pallas LstmCell forward. Returns (new_h, new_c), each (B, H)."""
    B, in_size = x.shape
    H = h.shape[1]
    four_h = 4 * H
    assert wxT.shape == (in_size, four_h)
    assert whT.shape == (H, four_h)
    assert b2.shape == (1, four_h)

    # Batch tile: whole batch if small, else 128 rows (fills the MXU M dim).
    if B <= 128:
        tm = B
    else:
        tm = 128
        assert B % tm == 0, "batch must be a multiple of 128 when B > 128"
    grid = (B // tm,)

    def batch_spec(cols):
        return pl.BlockSpec((tm, cols), lambda i: (i, 0))

    def const_spec(shape):
        # Same block for every grid step -> weights/bias stay resident in VMEM.
        return pl.BlockSpec(shape, lambda i: (0, 0))

    out_shapes = (
        jax.ShapeDtypeStruct((B, H), x.dtype),  # new hidden state
        jax.ShapeDtypeStruct((B, H), c.dtype),  # new cell state
    )

    new_h, new_c = pl.pallas_call(
        _lstm_cell_kernel,
        out_shape=out_shapes,
        grid_spec=pltpu.PrefetchScalarGridSpec(
            num_scalar_prefetch=0,
            grid=grid,
            in_specs=[
                batch_spec(in_size),   # x
                batch_spec(H),         # h
                batch_spec(H),         # c
                const_spec(wxT.shape),
                const_spec(whT.shape),
                const_spec(b2.shape),
            ],
            out_specs=[
                batch_spec(H),
                batch_spec(H),
            ],
        ),
        compiler_params=pltpu.CompilerParams(
            dimension_semantics=("parallel",)),
    )(x, h, c, wxT, whT, b2)
    return new_h, new_c


def lstm_cell_reference(x, h, c, weight, bias):
    """Plain-JAX reference with the exact PyTorch forward formulas."""
    H = h.shape[1]
    combined = jnp.concatenate([x, h], axis=1)
    gates = combined @ weight.T + bias
    f = gates[:, 0 * H:1 * H]
    i = gates[:, 1 * H:2 * H]
    g = gates[:, 2 * H:3 * H]
    o = gates[:, 3 * H:4 * H]
    sig = lambda v: 1.0 / (1.0 + jnp.exp(-v))
    tnh = lambda v: (jnp.exp(v) - jnp.exp(-v)) / (jnp.exp(v) + jnp.exp(-v))
    new_c = sig(f) * c + sig(i) * tnh(g)
    new_h = sig(o) * tnh(new_c)
    return new_h, new_c


if __name__ == "__main__":
    B = 8          # batch
    IN_SIZE = 32   # inSize
    H = 32         # hideSize

    key = jax.random.PRNGKey(0)
    kx, kh, kc, kw, kb = jax.random.split(key, 5)

    x = jax.random.normal(kx, (B, IN_SIZE), dtype=jnp.float32)
    h = jax.random.normal(kh, (B, H), dtype=jnp.float32)
    c = jax.random.normal(kc, (B, H), dtype=jnp.float32)

    stdv = 1.0 / (IN_SIZE + H) ** 0.5
    weight = jax.random.uniform(kw, (4 * H, IN_SIZE + H),
                                minval=-stdv, maxval=stdv, dtype=jnp.float32)
    bias = jax.random.uniform(kb, (4 * H,), minval=-stdv, maxval=stdv,
                              dtype=jnp.float32)

    # Prepare (transpose/split) parameters once, outside the hot path.
    wxT, whT, b2 = prepare_lstm_params(weight, bias)

    new_h, new_c = lstm_cell(x, h, c, wxT, whT, b2)
    jax.block_until_ready((new_h, new_c))

    ref_h, ref_c = lstm_cell_reference(x, h, c, weight, bias)
    assert jnp.allclose(new_h, ref_h, atol=1e-5, rtol=1e-5), "hidden mismatch"
    assert jnp.allclose(new_c, ref_c, atol=1e-5, rtol=1e-5), "cell mismatch"

    print("KERNEL_OK")
</pallas_src>

<mosaic_0001>
module attributes {stable_mosaic.version = 11 : i64} {
  func.func @_lstm_cell_kernel(%arg0: i32, %arg1: memref<8x32xf32, #tpu.memory_space<vmem>>, %arg2: memref<8x32xf32, #tpu.memory_space<vmem>>, %arg3: memref<8x32xf32, #tpu.memory_space<vmem>>, %arg4: memref<32x128xf32, #tpu.memory_space<vmem>>, %arg5: memref<32x128xf32, #tpu.memory_space<vmem>>, %arg6: memref<1x128xf32, #tpu.memory_space<vmem>>, %arg7: memref<8x32xf32, #tpu.memory_space<vmem>>, %arg8: memref<8x32xf32, #tpu.memory_space<vmem>>) attributes {dimension_semantics = [#tpu.dimension_semantics<parallel>], iteration_bounds = array<i64: 1>, scalar_prefetch = 0 : i64, scratch_operands = 0 : i64, tpu.core_type = #tpu.core_type<tc>, window_params = [{transform_indices = @transform_0, window_bounds = array<i64: 8, 32>}, {transform_indices = @transform_1, window_bounds = array<i64: 8, 32>}, {transform_indices = @transform_2, window_bounds = array<i64: 8, 32>}, {pipeline_mode = #tpu.pipeline_mode<synchronous>, transform_indices = @transform_3, window_bounds = array<i64: 32, 128>}, {pipeline_mode = #tpu.pipeline_mode<synchronous>, transform_indices = @transform_4, window_bounds = array<i64: 32, 128>}, {pipeline_mode = #tpu.pipeline_mode<synchronous>, transform_indices = @transform_5, window_bounds = array<i64: 1, 128>}, {transform_indices = @transform_6, window_bounds = array<i64: 8, 32>}, {transform_indices = @transform_7, window_bounds = array<i64: 8, 32>}]} {
    %c0 = arith.constant 0 : index
    %c0_0 = arith.constant 0 : index
    %0 = vector.load %arg1[%c0, %c0_0] : memref<8x32xf32, #tpu.memory_space<vmem>>, vector<8x32xf32>
    %c0_1 = arith.constant 0 : index
    %c0_2 = arith.constant 0 : index
    %1 = vector.load %arg4[%c0_1, %c0_2] : memref<32x128xf32, #tpu.memory_space<vmem>>, vector<32x128xf32>
    %cst = arith.constant dense<0.000000e+00> : vector<8x128xf32>
    %2 = tpu.matmul %0, %1, %cst {dimension_numbers = #tpu.dot_dimension_numbers<[1], [0], [0], [1], [0, 0, 1, 1], [], []>} : vector<8x32xf32>, vector<32x128xf32>, vector<8x128xf32> -> vector<8x128xf32>
    %c0_3 = arith.constant 0 : index
    %c0_4 = arith.constant 0 : index
    %3 = vector.load %arg2[%c0_3, %c0_4] : memref<8x32xf32, #tpu.memory_space<vmem>>, vector<8x32xf32>
    %c0_5 = arith.constant 0 : index
    %c0_6 = arith.constant 0 : index
    %4 = vector.load %arg5[%c0_5, %c0_6] : memref<32x128xf32, #tpu.memory_space<vmem>>, vector<32x128xf32>
    %cst_7 = arith.constant dense<0.000000e+00> : vector<8x128xf32>
    %5 = tpu.matmul %3, %4, %cst_7 {dimension_numbers = #tpu.dot_dimension_numbers<[1], [0], [0], [1], [0, 0, 1, 1], [], []>} : vector<8x32xf32>, vector<32x128xf32>, vector<8x128xf32> -> vector<8x128xf32>
    %6 = arith.addf %2, %5 : vector<8x128xf32>
    %c0_8 = arith.constant 0 : index
    %c0_9 = arith.constant 0 : index
    %7 = vector.load %arg6[%c0_8, %c0_9] : memref<1x128xf32, #tpu.memory_space<vmem>>, vector<1x128xf32>
    %8 = vector.broadcast %7 : vector<1x128xf32> to vector<8x128xf32>
    %9 = arith.addf %6, %8 : vector<8x128xf32>
    %10 = vector.extract_strided_slice %9 {offsets = [0, 0], sizes = [8, 32], strides = [1, 1]} : vector<8x128xf32> to vector<8x32xf32>
    %11 = vector.extract_strided_slice %9 {offsets = [0, 32], sizes = [8, 32], strides = [1, 1]} : vector<8x128xf32> to vector<8x32xf32>
    %12 = vector.extract_strided_slice %9 {offsets = [0, 64], sizes = [8, 32], strides = [1, 1]} : vector<8x128xf32> to vector<8x32xf32>
    %13 = vector.extract_strided_slice %9 {offsets = [0, 96], sizes = [8, 32], strides = [1, 1]} : vector<8x128xf32> to vector<8x32xf32>
    %c0_10 = arith.constant 0 : index
    %c0_11 = arith.constant 0 : index
    %14 = vector.load %arg3[%c0_10, %c0_11] : memref<8x32xf32, #tpu.memory_space<vmem>>, vector<8x32xf32>
    %cst_12 = arith.constant 5.000000e-01 : f32
    %15 = vector.broadcast %cst_12 : f32 to vector<8x32xf32>
    %16 = arith.mulf %15, %10 : vector<8x32xf32>
    %17 = math.tanh %16 : vector<8x32xf32>
    %cst_13 = arith.constant 1.000000e+00 : f32
    %18 = vector.broadcast %cst_13 : f32 to vector<8x32xf32>
    %19 = arith.addf %17, %18 : vector<8x32xf32>
    %cst_14 = arith.constant 5.000000e-01 : f32
    %20 = vector.broadcast %cst_14 : f32 to vector<8x32xf32>
    %21 = arith.mulf %20, %19 : vector<8x32xf32>
    %22 = arith.mulf %21, %14 : vector<8x32xf32>
    %cst_15 = arith.constant 5.000000e-01 : f32
    %23 = vector.broadcast %cst_15 : f32 to vector<8x32xf32>
    %24 = arith.mulf %23, %11 : vector<8x32xf32>
    %25 = math.tanh %24 : vector<8x32xf32>
    %cst_16 = arith.constant 1.000000e+00 : f32
    %26 = vector.broadcast %cst_16 : f32 to vector<8x32xf32>
    %27 = arith.addf %25, %26 : vector<8x32xf32>
    %cst_17 = arith.constant 5.000000e-01 : f32
    %28 = vector.broadcast %cst_17 : f32 to vector<8x32xf32>
    %29 = arith.mulf %28, %27 : vector<8x32xf32>
    %30 = math.tanh %12 : vector<8x32xf32>
    %31 = arith.mulf %29, %30 : vector<8x32xf32>
    %32 = arith.addf %22, %31 : vector<8x32xf32>
    %cst_18 = arith.constant 5.000000e-01 : f32
    %33 = vector.broadcast %cst_18 : f32 to vector<8x32xf32>
    %34 = arith.mulf %33, %13 : vector<8x32xf32>
    %35 = math.tanh %34 : vector<8x32xf32>
    %cst_19 = arith.constant 1.000000e+00 : f32
    %36 = vector.broadcast %cst_19 : f32 to vector<8x32xf32>
    %37 = arith.addf %35, %36 : vector<8x32xf32>
    %cst_20 = arith.constant 5.000000e-01 : f32
    %38 = vector.broadcast %cst_20 : f32 to vector<8x32xf32>
    %39 = arith.mulf %38, %37 : vector<8x32xf32>
    %40 = math.tanh %32 : vector<8x32xf32>
    %41 = arith.mulf %39, %40 : vector<8x32xf32>
    %c0_21 = arith.constant 0 : index
    %c0_22 = arith.constant 0 : index
    %42 = vector.load %arg8[%c0_21, %c0_22] : memref<8x32xf32, #tpu.memory_space<vmem>>, vector<8x32xf32>
    tpu.vector_store %arg8[%c0_21, %c0_22], %32 {strides = array<i32>} : memref<8x32xf32, #tpu.memory_space<vmem>>, vector<8x32xf32>,
    %c0_23 = arith.constant 0 : index
    %c0_24 = arith.constant 0 : index
    %43 = vector.load %arg7[%c0_23, %c0_24] : memref<8x32xf32, #tpu.memory_space<vmem>>, vector<8x32xf32>
    tpu.vector_store %arg7[%c0_23, %c0_24], %41 {strides = array<i32>} : memref<8x32xf32, #tpu.memory_space<vmem>>, vector<8x32xf32>,
    return
  }
  func.func @transform_0(%arg0: i32) -> (i32, i32) {
    %c0_i32 = arith.constant 0 : i32
    %c0_i32_0 = arith.constant 0 : i32
    return %arg0, %c0_i32 : i32, i32
  }
  func.func @transform_1(%arg0: i32) -> (i32, i32) {
    %c0_i32 = arith.constant 0 : i32
    %c0_i32_0 = arith.constant 0 : i32
    return %arg0, %c0_i32 : i32, i32
  }
  func.func @transform_2(%arg0: i32) -> (i32, i32) {
    %c0_i32 = arith.constant 0 : i32
    %c0_i32_0 = arith.constant 0 : i32
    return %arg0, %c0_i32 : i32, i32
  }
  func.func @transform_3(%arg0: i32) -> (i32, i32) {
    %c0_i32 = arith.constant 0 : i32
    %c0_i32_0 = arith.constant 0 : i32
    %c0_i32_1 = arith.constant 0 : i32
    return %c0_i32, %c0_i32_0 : i32, i32
  }
  func.func @transform_4(%arg0: i32) -> (i32, i32) {
    %c0_i32 = arith.constant 0 : i32
    %c0_i32_0 = arith.constant 0 : i32
    %c0_i32_1 = arith.constant 0 : i32
    return %c0_i32, %c0_i32_0 : i32, i32
  }
  func.func @transform_5(%arg0: i32) -> (i32, i32) {
    %c0_i32 = arith.constant 0 : i32
    %c0_i32_0 = arith.constant 0 : i32
    %c0_i32_1 = arith.constant 0 : i32
    return %c0_i32, %c0_i32_0 : i32, i32
  }
  func.func @transform_6(%arg0: i32) -> (i32, i32) {
    %c0_i32 = arith.constant 0 : i32
    %c0_i32_0 = arith.constant 0 : i32
    return %arg0, %c0_i32 : i32, i32
  }
  func.func @transform_7(%arg0: i32) -> (i32, i32) {
    %c0_i32 = arith.constant 0 : i32
    %c0_i32_0 = arith.constant 0 : i32
    return %arg0, %c0_i32 : i32, i32
  }
}

</mosaic_0001>

<bundles_post_ra>
// kernel: tpu_custom_call.1
= control target key start
LH: loop header
LB: loop body
LE: loop exit
PB: predicated region body
PF: predicated region fallthrough
CT: control target
= control target key end

     0   :  { %13 = vsyncpa [#allocation3], 0  ;;  %s605_s0 = inlined_call_operand.hbm [shape: f32[8,32], index: 0, kind: input, shape index: {}]   ;;  %s606_s1 = inlined_call_operand.hbm [shape: f32[8,32], index: 1, kind: input, shape index: {}]   ;;  %s607_s2 = inlined_call_operand.hbm [shape: f32[8,32], index: 2, kind: input, shape index: {}]   ;;  %s608_s3 = inlined_call_operand.hbm [shape: f32[32,128], index: 3, kind: input, shape index: {}]   ;;  %s609_s4 = inlined_call_operand.hbm [shape: f32[32,128], index: 4, kind: input, shape index: {}]   ;;  %s610_s5 = inlined_call_operand.vmem [shape: f32[1,128], index: 5, kind: input, shape index: {}]   ;;  %s611_s6 = inlined_call_operand.hbm [shape: f32[8,32], index: 6, kind: output, shape index: {0}]   ;;  %s612_s7 = inlined_call_operand.hbm [shape: f32[8,32], index: 7, kind: output, shape index: {1}]  }
   0x1   :  { %14 = vsyncpa [#allocation6], 0 }
   0x2   :  { %15 = vsyncpa [#allocation9], 0 }
   0x3   :  { %16 = vsyncpa [#allocation4], 0 }
   0x4   :  { %17 = vsyncpa [#allocation13], 0  ;;  %s518_s24 = smov [#allocation5]   ;;  %s519_s26 = smov [#allocation8]  }
   0x5   :  { %s34_s25 = sshll.u32 %s518_s24, 4  ;;  %s53_s27 = sshll.u32 %s519_s26, 4  ;;  %s35_s25 = int_to_ptr.vmem [resolvable:$true] %s34_s25  ;;  %s54_s27 = int_to_ptr.vmem [resolvable:$true] %s53_s27 }
   0x6   :  { %s376_s28 = scalar_lea.vmem %s35_s25, 128  ;;  %p381_p1 = scmp.lt.s32.totalorder %s35_s25, %s35_s25 }
   0x7   :  { %p377_p0 = scmp.ne.s32.totalorder %s35_s25, %s376_s28  ;;  %p382_p2 = scmp.lt.s32.totalorder %s376_s28, %s376_s28 }
   0x9   :  { %p383_p3 = por %p382_p2, %p381_p1 }
   0xb   :  { %p384_p4 = pnand %p383_p3, %p377_p0 }
   0xd   :  { %387 = shalt.err (!%p384_p4)
}
   0xe   :  { %37 = dma.hbm_to_vmem [thread:$0]  %s606_s1, 128, %s35_s25, [#allocation6]  }
   0xf   :  { %s396_s8 = scalar_lea.vmem %s54_s27, 512  ;;  %p401_p6 = scmp.lt.s32.totalorder %s54_s27, %s54_s27 }
  0x10   :  { %p397_p5 = scmp.ne.s32.totalorder %s54_s27, %s396_s8  ;;  %p402_p7 = scmp.lt.s32.totalorder %s396_s8, %s396_s8 }
  0x12   :  { %p403_p8 = por %p402_p7, %p401_p6 }
  0x14   :  { %p404_p9 = pnand %p403_p8, %p397_p5 }
  0x16   :  { %407 = shalt.err (!%p404_p9)
}
  0x17   :  { %s520_s9 = smov 128   ;;  %s521_s10 = smov 8  }
  0x18   :  { %59 = dma.hbm_to_vmem [thread:$0]  %s608_s3, 512, %s54_s27, [#allocation9], %s520_s9, %s520_s9, %s521_s10  }
  0x19   :  { %s522_s13 = smov [#allocation2]   ;;  %s523_s15 = smov [#allocation7]  }
  0x1a   :  { %s24_s14 = sshll.u32 %s522_s13, 4  ;;  %s44_s1 = sshll.u32 %s523_s15, 4  ;;  %s25_s14 = int_to_ptr.vmem [resolvable:$true] %s24_s14  ;;  %s45_s1 = int_to_ptr.vmem [resolvable:$true] %s44_s1 }
  0x1b   :  { %s416_s16 = scalar_lea.vmem %s25_s14, 128  ;;  %p421_p11 = scmp.lt.s32.totalorder %s25_s14, %s25_s14 }
  0x1c   :  { %p417_p10 = scmp.ne.s32.totalorder %s25_s14, %s416_s16  ;;  %p422_p12 = scmp.lt.s32.totalorder %s416_s16, %s416_s16 }
  0x1e   :  { %p423_p13 = por %p422_p12, %p421_p11 }
  0x20   :  { %p424_p0 = pnand %p423_p13, %p417_p10 }
  0x22   :  { %427 = shalt.err (!%p424_p0)
}
  0x23   :  { %27 = dma.hbm_to_vmem [thread:$0]  %s605_s0, 128, %s25_s14, [#allocation3]  }
  0x24   :  { %s436_s19 = scalar_lea.vmem %s45_s1, 128  ;;  %p441_p2 = scmp.lt.s32.totalorder %s45_s1, %s45_s1 }
  0x25   :  { %p437_p1 = scmp.ne.s32.totalorder %s45_s1, %s436_s19  ;;  %p442_p3 = scmp.lt.s32.totalorder %s436_s19, %s436_s19 }
  0x27   :  { %p443_p4 = por %p442_p3, %p441_p2 }
  0x29   :  { %p444_p5 = pnand %p443_p4, %p437_p1 }
  0x2b   :  { %447 = shalt.err (!%p444_p5)
}
  0x2c   :  { %47 = dma.hbm_to_vmem [thread:$0]  %s607_s2, 128, %s45_s1, [#allocation6]  }
  0x2d   :  { %s524_s21 = smov [#allocation10]  }
  0x2e   :  { %s65_s22 = sshll.u32 %s524_s21, 4  ;;  %s66_s22 = int_to_ptr.vmem [resolvable:$true] %s65_s22 }
  0x2f   :  { %s456_s23 = scalar_lea.vmem %s66_s22, 512  ;;  %p461_p7 = scmp.lt.s32.totalorder %s66_s22, %s66_s22 }
  0x30   :  { %p457_p6 = scmp.ne.s32.totalorder %s66_s22, %s456_s23  ;;  %p462_p8 = scmp.lt.s32.totalorder %s456_s23, %s456_s23 }
  0x32   :  { %p463_p9 = por %p462_p8, %p461_p7 }
  0x34   :  { %p464_p10 = pnand %p463_p9, %p457_p6 }
  0x36   :  { %467 = shalt.err (!%p464_p10)
}
  0x37   :  { %71 = dma.hbm_to_vmem [thread:$0]  %s609_s4, 512, %s66_s22, [#allocation9], %s520_s9, %s520_s9, %s521_s10  }
  0x38   :  { %508 = dma.done.wait [#allocation3], 128  }
  0x39   :  { %509 = vsyncadd [#allocation3], 4294967168 }
  0x3a   :  { %510 = dma.done.wait [#allocation6], 256  }
  0x3b   :  { %511 = vsyncadd [#allocation6], 4294967040 }
  0x3c   :  { %512 = dma.done.wait [#allocation9], 1024  }
  0x3d   :  { %513 = vsyncadd [#allocation9], 4294966272  ;;  %v525_v0 = vmov 0.0   ;;  %vm526_vm0 = vmmov 0   ;;  %v98_v1 = vld [vmem:[#allocation10 + $0x18] sm:$0xff]  ;;  %v97_v3 = vld [vmem:[#allocation10 + $0x10] sm:$0xff] }
  0x3e   :  { %327 = vmatprep.subr.mxu0 %v525_v0  ;;  %338 = vmatprep.subr.mxu1 %v525_v0  ;;  %v93_v2 = vld [vmem:[#allocation8 + $0x18] sm:$0xff]  ;;  %v92_v4 = vld [vmem:[#allocation8 + $0x10] sm:$0xff]  ;;  %v96_v5 = vld [vmem:[#allocation10 + $0x8] sm:$0xff]  ;;  %vm99_vm1 = vcmask 261120   ;;  %s527_s25 = smov 96  }
  0x3f   :  { %335 = vmatprep.mubr.msk.f32.mxu0 %vm526_vm0, %v525_v0  ;;  %346 = vmatprep.mubr.msk.f32.mxu1 %vm526_vm0, %v525_v0  ;;  %v91_v6 = vld [vmem:[#allocation8 + $0x8] sm:$0xff]  ;;  %v95_v7 = vld [vmem:[#allocation10] sm:$0xff]  ;;  %v94_v9 = vld [vmem:[#allocation5] sm:$0xff] }
  0x40   :  { %328 = vmatpush3.msra.mxu0 %v98_v1  ;;  %339 = vmatpush3.msra.mxu1 %v93_v2  ;;  %v90_v8 = vld [vmem:[#allocation8] sm:$0xff]  ;;  %v89_v10 = vld [vmem:[#allocation2] sm:$0xff]  ;;  %v254_v25 = vld [vmem:[#allocation7] sm:$0xff] }
  0x41   :  { %329 = vmatprep.subr.mxu0 %v525_v0  ;;  %340 = vmatprep.subr.mxu1 %v525_v0  ;;  %v316_v13 = vld [vmem:[%s610_s5] ss:$0 sm:$0xff]  ;;  %s528_s5 = smov [#allocation12]  }
  0x42   :  { %330 = vmatpush3.msra.mxu0 %v97_v3  ;;  %341 = vmatpush3.msra.mxu1 %v92_v4  ;;  %s299_s26 = sshll.u32 %s528_s5, 4  ;;  %s300_s26 = int_to_ptr.vmem [resolvable:$true] %s299_s26 }
  0x43   :  { %331 = vmatprep.subr.mxu0 %v525_v0  ;;  %342 = vmatprep.subr.mxu1 %v525_v0  ;;  %s468_s27 = scalar_lea.vmem %s300_s26, 128  ;;  %p473_p12 = scmp.lt.s32.totalorder %s300_s26, %s300_s26 }
  0x44   :  { %332 = vmatpush3.msra.mxu0 %v96_v5  ;;  %343 = vmatpush3.msra.mxu1 %v91_v6  ;;  %p469_p11 = scmp.ne.s32.totalorder %s300_s26, %s468_s27  ;;  %p474_p13 = scmp.lt.s32.totalorder %s468_s27, %s468_s27 }
  0x45   :  { %333 = vmatprep.subr.mxu0 %v525_v0  ;;  %344 = vmatprep.subr.mxu1 %v525_v0 }
  0x46   :  { %334 = vmatpush3.msra.mxu0 %v95_v7  ;;  %345 = vmatpush3.msra.mxu1 %v90_v8  ;;  %p475_p0 = por %p474_p13, %p473_p12 }
  0x47   :  { %336 = vmatmul.mubr.msk.f32.vlgmr.msra.gmra.mxu0 %vm99_vm1, %v94_v9  ;;  %347 = vmatmul.mubr.msk.f32.vlgmr.msra.gmra.mxu1 %vm99_vm1, %v89_v10 }
  0x48   :  { %p476_p1 = pnand %p475_p0, %p469_p11 }
 0x107   :  { %v169_v11 = vpop.f32.mrf.mxu0  ;;  %v242_v12 = vpop.f32.mrf.mxu1 }
 0x108   :  { %v243_v14 = vadd.f32 %v242_v12, %v169_v11 }
 0x109   :  { %v337_v15 = vpop.f32.mrf.mxu0  ;;  %v348_v16 = vpop.f32.mrf.mxu1 }
 0x10a   :  { %v253_v17 = vadd.f32 %v316_v13, %v243_v14 }
 0x10c   :  { %362 = vtanh.f32 %v253_v17  ;;  %v255_v19 = vmul.f32 0.5, %v253_v17 }
 0x10e   :  { %364 = vtanh.f32 %v255_v19 }
 0x119   :  { %v363_v18 = vpop.eup %362 }
 0x11a   :  { %262 = vrot.lane.b32.xlu0 %v363_v18, %s527_s25 }
 0x11b   :  { %v365_v20 = vpop.eup %364 }
 0x11c   :  { %v257_v21 = vadd.f32 1.0, %v365_v20 }
 0x11e   :  { %v258_v22 = vmul.f32 0.5, %v257_v21 }
 0x120   :  { %v259_v26 = vmul.f32 %v258_v22, %v254_v25 }
 0x18c   :  { %v263_v23 = vpop.permute.xlu0 %262 }
 0x18d   :  { %v265_v24 = vmul.f32 %v263_v23, %v258_v22 }
 0x18f   :  { %267 = vrot.lane.b32.xlu0 %v265_v24, %s527_s25 }
 0x201   :  { %v268_v27 = vpop.permute.xlu0 %267 }
 0x202   :  { %v270_v28 = vadd.f32 %v268_v27, %v259_v26 }
 0x204   :  { %366 = vtanh.f32 %v270_v28  ;;  %277 = vst.msk [vmem:[#allocation12] sm:$0xff] %vm99_vm1, %v270_v28 }
 0x211   :  { %v367_v29 = vpop.eup %366 }
 0x212   :  { %273 = vrot.lane.b32.xlu1 %v367_v29, %s527_s25 }
 0x213   :  { %479 = shalt.err (!%p476_p1)
}
 0x214   :  { %302 = dma.vmem_to_hbm [thread:$0]  %s300_s26, 128, %s612_s7, [#allocation13]  }
 0x215   :  { %s529_s30 = smov 32   ;;  %s530_s8 = smov [#allocation11]  }
 0x216   :  { %s289_s9 = sshll.u32 %s530_s8, 4  ;;  %s290_s9 = int_to_ptr.vmem [resolvable:$true] %s289_s9 }
 0x217   :  { %s488_s10 = scalar_lea.vmem %s290_s9, 128  ;;  %p493_p3 = scmp.lt.s32.totalorder %s290_s9, %s290_s9 }
 0x218   :  { %p489_p2 = scmp.ne.s32.totalorder %s290_s9, %s488_s10  ;;  %p494_p4 = scmp.lt.s32.totalorder %s488_s10, %s488_s10 }
 0x21a   :  { %p495_p5 = por %p494_p4, %p493_p3 }
 0x21c   :  { %p496_p6 = pnand %p495_p5, %p489_p2 }
 0x284   :  { %v274_v30 = vpop.permute.xlu1 %273 }
 0x285   :  { %v276_v31 = vmul.f32 %v274_v30, %v258_v22 }
 0x287   :  { %279 = vrot.lane.b32.xlu1 %v276_v31, %s529_s30 }
 0x2f9   :  { %v280_v32 = vpop.permute.xlu1 %279 }
 0x2fa   :  { %282 = vst.msk [vmem:[#allocation11] sm:$0xff] %vm99_vm1, %v280_v32 }
 0x2fb   :  { %499 = shalt.err (!%p496_p6)
}
 0x2fc   :  { %292 = dma.vmem_to_hbm [thread:$0]  %s290_s9, 128, %s611_s6, [#allocation4]  }
 0x2fd   :  { %514 = dma.done.wait [#allocation4], 128  }
 0x2fe   :  { %515 = vsyncadd [#allocation4], 4294967168 }
 0x2ff   :  { %516 = dma.done.wait [#allocation13], 128  }
 0x300   :  { %517 = vsyncadd [#allocation13], 4294967168 }
 0x301   :  { %309 = vsyncpa [#allocation3], 1 }
 0x302   :  { %310 = vsyncpa [#allocation6], 1 }
 0x303   :  { %311 = vsyncpa [#allocation9], 1 }
 0x304   :  { %312 = vsyncpa [#allocation4], 1 }
 0x305   :  { %313 = vsyncpa [#allocation13], 1 }

</bundles_post_ra>
